<compile_context>
chip_gen: v5e
topology: v5e:2x2
jax: 0.10.0
libtpu: 0.0.40
codegen_flags: <defaults>
</compile_context>

<pallas_src>
import functools

import jax
import jax.numpy as jnp
from jax.experimental import pallas as pl
from jax.experimental.pallas import tpu as pltpu

EPS = 1e-3  # BatchNorm2d(192, eps=0.001)


def _bn_relu_kernel(x_ref, gamma_ref, beta_ref, o_ref, *, eps):
    # x_ref / o_ref: (C_blk, M) ; gamma_ref / beta_ref: (C_blk, 1) f32.
    inv_m = jnp.float32(1.0 / x_ref.shape[-1])

    # ---- Pass 1: per-channel mean (load #1; x vregs dead after the reduce) --
    x1 = x_ref[...].astype(jnp.float32)                       # (C_blk, M)
    mean = jnp.sum(x1, axis=-1, keepdims=True) * inv_m        # (C_blk, 1)

    # ---- Pass 2: centered variance + normalize + ReLU (load #2) ------------
    d = x_ref[...].astype(jnp.float32) - mean                 # (C_blk, M)
    var = jnp.sum(d * d, axis=-1, keepdims=True) * inv_m      # biased (train)
    scale = gamma_ref[...] * jax.lax.rsqrt(var + eps)         # (C_blk, 1)
    y = d * scale + beta_ref[...]                             # x*s + shift
    o_ref[...] = jnp.maximum(y, 0.0).astype(o_ref.dtype)


def batchnorm_relu(x_nchw, gamma, beta, *, eps=EPS):
    """Training-mode BatchNorm2d (batch stats, affine) + ReLU.

    x_nchw: (N, C, H, W) float32
    gamma, beta: (C,) float32
    returns: (N, C, H, W) float32
    """
    N, C, H, W = x_nchw.shape
    HW = H * W
    M = N * HW  # per-channel reduction length

    if N == 1:
        # Pure reshape — NCHW consumed as-is, no transpose/copy in XLA.
        x2 = x_nchw.reshape(C, M)
    else:
        # N > 1 needs channel-major layout; this transpose is an XLA copy.
        # TODO(synk): for N > 1, fold the batch into lanes inside the kernel
        # (Squeezed leading block dim) to avoid this transpose.
        x2 = jnp.transpose(x_nchw, (1, 0, 2, 3)).reshape(C, M)

    gamma2 = gamma.reshape(C, 1).astype(jnp.float32)
    beta2 = beta.reshape(C, 1).astype(jnp.float32)

    # Channel-block grid: 2 independent blocks (per-channel stats) so v7x can
    # shard them across both TensorCores; requires a sublane-aligned block.
    if C % 2 == 0 and (C // 2) % 8 == 0:
        c_blk = C // 2
    else:
        c_blk = C
    grid = (C // c_blk,)

    out2 = pl.pallas_call(
        functools.partial(_bn_relu_kernel, eps=eps),
        out_shape=jax.ShapeDtypeStruct((C, M), x_nchw.dtype),
        grid=grid,
        in_specs=[
            pl.BlockSpec((c_blk, M), lambda i: (i, 0)),
            pl.BlockSpec((c_blk, 1), lambda i: (i, 0)),
            pl.BlockSpec((c_blk, 1), lambda i: (i, 0)),
        ],
        out_specs=pl.BlockSpec((c_blk, M), lambda i: (i, 0)),
        compiler_params=pltpu.CompilerParams(
            dimension_semantics=("parallel",),
        ),
    )(x2, gamma2, beta2)

    if N == 1:
        return out2.reshape(N, C, H, W)  # pure reshape back to NCHW
    return jnp.transpose(out2.reshape(C, N, H, W), (1, 0, 2, 3))


def _reference(x_nchw, gamma, beta):
    mean = jnp.mean(x_nchw, axis=(0, 2, 3), keepdims=True)
    var = jnp.mean((x_nchw - mean) ** 2, axis=(0, 2, 3), keepdims=True)
    y = (x_nchw - mean) * jax.lax.rsqrt(var + EPS)
    y = y * gamma.reshape(1, -1, 1, 1) + beta.reshape(1, -1, 1, 1)
    return jnp.maximum(y, 0.0)


if __name__ == "__main__":
    key = jax.random.PRNGKey(0)
    kx, kg, kb = jax.random.split(key, 3)

    N, C, H, W = 1, 192, 12, 12  # matches x238 = randn([1, 192, 12, 12])
    x = jax.random.normal(kx, (N, C, H, W), dtype=jnp.float32)
    # PyTorch default init is gamma=1, beta=0; perturb deterministically to
    # exercise the affine path.
    gamma = 1.0 + 0.1 * jax.random.normal(kg, (C,), dtype=jnp.float32)
    beta = 0.1 * jax.random.normal(kb, (C,), dtype=jnp.float32)

    out = batchnorm_relu(x, gamma, beta)
    out = jax.block_until_ready(out)

    ref = _reference(x, gamma, beta)
    assert out.shape == (N, C, H, W)
    assert jnp.allclose(out, ref, atol=1e-5, rtol=1e-5), "mismatch vs reference"

    print("KERNEL_OK")
</pallas_src>

<mosaic_0001>
module attributes {stable_mosaic.version = 11 : i64} {
  func.func @_bn_relu_kernel(%arg0: i32, %arg1: memref<96x144xf32, #tpu.memory_space<vmem>>, %arg2: memref<96x1xf32, #tpu.memory_space<vmem>>, %arg3: memref<96x1xf32, #tpu.memory_space<vmem>>, %arg4: memref<96x144xf32, #tpu.memory_space<vmem>>) attributes {dimension_semantics = [#tpu.dimension_semantics<parallel>], iteration_bounds = array<i64: 2>, scalar_prefetch = 0 : i64, scratch_operands = 0 : i64, tpu.core_type = #tpu.core_type<tc>, window_params = [{transform_indices = @transform_0, window_bounds = array<i64: 96, 144>}, {transform_indices = @transform_1, window_bounds = array<i64: 96, 1>}, {transform_indices = @transform_2, window_bounds = array<i64: 96, 1>}, {transform_indices = @transform_3, window_bounds = array<i64: 96, 144>}]} {
    %c0 = arith.constant 0 : index
    %c0_0 = arith.constant 0 : index
    %0 = vector.load %arg1[%c0, %c0_0] : memref<96x144xf32, #tpu.memory_space<vmem>>, vector<96x144xf32>
    %cst = arith.constant dense<0.000000e+00> : vector<96xf32>
    %1 = vector.multi_reduction <add>, %0, %cst [1] : vector<96x144xf32> to vector<96xf32>
    %2 = vector.shape_cast %1 : vector<96xf32> to vector<96x1xf32>
    %cst_1 = arith.constant 0.0069444445 : f32
    %3 = vector.broadcast %cst_1 : f32 to vector<96x1xf32>
    %4 = arith.mulf %2, %3 : vector<96x1xf32>
    %c0_2 = arith.constant 0 : index
    %c0_3 = arith.constant 0 : index
    %5 = vector.load %arg1[%c0_2, %c0_3] : memref<96x144xf32, #tpu.memory_space<vmem>>, vector<96x144xf32>
    %6 = vector.broadcast %4 : vector<96x1xf32> to vector<96x144xf32>
    %7 = arith.subf %5, %6 : vector<96x144xf32>
    %8 = arith.mulf %7, %7 : vector<96x144xf32>
    %cst_4 = arith.constant dense<0.000000e+00> : vector<96xf32>
    %9 = vector.multi_reduction <add>, %8, %cst_4 [1] : vector<96x144xf32> to vector<96xf32>
    %10 = vector.shape_cast %9 : vector<96xf32> to vector<96x1xf32>
    %cst_5 = arith.constant 0.0069444445 : f32
    %11 = vector.broadcast %cst_5 : f32 to vector<96x1xf32>
    %12 = arith.mulf %10, %11 : vector<96x1xf32>
    %c0_6 = arith.constant 0 : index
    %c0_7 = arith.constant 0 : index
    %13 = vector.load %arg2[%c0_6, %c0_7] : memref<96x1xf32, #tpu.memory_space<vmem>>, vector<96x1xf32>
    %cst_8 = arith.constant 1.000000e-03 : f32
    %14 = vector.broadcast %cst_8 : f32 to vector<96x1xf32>
    %15 = arith.addf %12, %14 : vector<96x1xf32>
    %16 = math.rsqrt %15 : vector<96x1xf32>
    %17 = arith.mulf %13, %16 : vector<96x1xf32>
    %18 = vector.broadcast %17 : vector<96x1xf32> to vector<96x144xf32>
    %19 = arith.mulf %7, %18 : vector<96x144xf32>
    %c0_9 = arith.constant 0 : index
    %c0_10 = arith.constant 0 : index
    %20 = vector.load %arg3[%c0_9, %c0_10] : memref<96x1xf32, #tpu.memory_space<vmem>>, vector<96x1xf32>
    %21 = vector.broadcast %20 : vector<96x1xf32> to vector<96x144xf32>
    %22 = arith.addf %19, %21 : vector<96x144xf32>
    %cst_11 = arith.constant 0.000000e+00 : f32
    %23 = vector.broadcast %cst_11 : f32 to vector<96x144xf32>
    %24 = arith.maximumf %22, %23 : vector<96x144xf32>
    %c0_12 = arith.constant 0 : index
    %c0_13 = arith.constant 0 : index
    %25 = vector.load %arg4[%c0_12, %c0_13] : memref<96x144xf32, #tpu.memory_space<vmem>>, vector<96x144xf32>
    tpu.vector_store %arg4[%c0_12, %c0_13], %24 {strides = array<i32>} : memref<96x144xf32, #tpu.memory_space<vmem>>, vector<96x144xf32>,
    return
  }
  func.func @transform_0(%arg0: i32) -> (i32, i32) {
    %c0_i32 = arith.constant 0 : i32
    %c0_i32_0 = arith.constant 0 : i32
    return %arg0, %c0_i32 : i32, i32
  }
  func.func @transform_1(%arg0: i32) -> (i32, i32) {
    %c0_i32 = arith.constant 0 : i32
    %c0_i32_0 = arith.constant 0 : i32
    return %arg0, %c0_i32 : i32, i32
  }
  func.func @transform_2(%arg0: i32) -> (i32, i32) {
    %c0_i32 = arith.constant 0 : i32
    %c0_i32_0 = arith.constant 0 : i32
    return %arg0, %c0_i32 : i32, i32
  }
  func.func @transform_3(%arg0: i32) -> (i32, i32) {
    %c0_i32 = arith.constant 0 : i32
    %c0_i32_0 = arith.constant 0 : i32
    return %arg0, %c0_i32 : i32, i32
  }
}

</mosaic_0001>

<bundles_post_ra>
// kernel: tpu_custom_call.1
= control target key start
LH: loop header
LB: loop body
LE: loop exit
PB: predicated region body
PF: predicated region fallthrough
CT: control target
= control target key end

     0   :  { %s962_s12 = smov 0   ;;  %s1529_s0 = inlined_call_operand.vmem [shape: f32[192,144], index: 0, kind: input, shape index: {}]   ;;  %s1530_s1 = inlined_call_operand.vmem [shape: f32[192,1], index: 1, kind: input, shape index: {}]   ;;  %s1531_s2 = inlined_call_operand.vmem [shape: f32[192,1], index: 2, kind: input, shape index: {}]   ;;  %s1532_s3 = inlined_call_operand.vmem [shape: f32[192,144], index: 3, kind: output, shape index: {}]  }
   0x1 LB: > { %s882_s13 = sadd.s32 4294967295, %s939_s12   ;;  %p886_p0 = scmp.ge.s32.totalorder %s939_s12, 1  ;;  %s939_s12 = sphi %s962_s12, %s13_s12  }
   0x2   : > { %p161_p1 = scmp.lt.s32.totalorder %s939_s12, 3 }
   0x4   : > { %p162_p2 = pnand %p886_p0, %p161_p1 }
   0x6   : > { %165 = sbr.rel (%p162_p2) target bundleno = 451 (0x1c3), region = 32 }
   0xb   : > { %s197_s14 = smul.u32 12, %s882_s13  ;;  %vm247_vm0 = vcmask 130048   ;;  %v941_v0 = vmov 0  }
   0xc   : > { %907 = vset.pattern.permute.xlu0 %v941_v0  ;;  %906 = vset.pattern.permute.xlu1 %v941_v0 }
   0xd   : > { %p198_p3 = scmp.lt.s32.totalorder %s197_s14, 23  ;;  %908 = vset.pattern.permute.xlu2 %v941_v0 }
   0xf   : > { %s1560_s14 = smov (!%p198_p3, %s197_s14), 23 }
  0x10   : > { %s895_s15 = sshll.u32 %s1560_s14, 4  ;;  %s889_s19 = sshll.u32 %s1560_s14, 3 }
  0x11   : > { %s978_s18 = scalar_lea.vmem %s1529_s0, %s895_s15  ;;  %s1094_s22 = scalar_lea.vmem %s1531_s2, %s889_s19 }
  0x12   : > { %v981_v1 = vld [vmem:[%s978_s18 + $0x20] sm:$0xff]  ;;  %v984_v2 = vld [vmem:[%s978_s18 + $0x28] sm:$0xff]  ;;  %v1006_v11 = vld [vmem:[%s978_s18 + $0x38] sm:$0xff]  ;;  %s1271_s25 = scalar_lea.vmem %s1530_s1, %s889_s19  ;;  %s1450_s28 = scalar_lea.vmem %s1532_s3, %s895_s15 }
  0x13   : > { %v987_v3 = vld [vmem:[%s978_s18] sm:$0xff]  ;;  %v256_v4 = vsel %vm247_vm0, %v984_v2, 0.0  ;;  %v992_v5 = vld [vmem:[%s978_s18 + $0x8] sm:$0xff]  ;;  %v1011_v14 = vld [vmem:[%s978_s18 + $0x18] sm:$0xff]  ;;  %v260_v17 = vsel %vm247_vm0, %v1006_v11, 0.0 }
  0x14   : > { %v995_v6 = vld [vmem:[%s978_s18 + $0x40] sm:$0xff]  ;;  %v998_v7 = vld [vmem:[%s978_s18 + $0x48] sm:$0xff]  ;;  %v257_v8 = vadd.f32 %v256_v4, %v981_v1  ;;  %v248_v9 = vsel %vm247_vm0, %v992_v5, 0.0  ;;  %v1014_v15 = vld [vmem:[%s978_s18 + $0x58] sm:$0xff]  ;;  %v252_v19 = vsel %vm247_vm0, %v1011_v14, 0.0 }
  0x15   : > { %v264_v10 = vsel %vm247_vm0, %v998_v7, 0.0  ;;  %v249_v12 = vadd.f32 %v248_v9, %v987_v3  ;;  %v1017_v16 = vld [vmem:[%s978_s18 + $0x30] sm:$0xff]  ;;  %v268_v21 = vsel %vm247_vm0, %v1014_v15, 0.0  ;;  %v1035_v25 = vld [vmem:[%s978_s18 + $0x78] sm:$0xff]  ;;  %v1038_v26 = vld [vmem:[%s978_s18 + $0x68] sm:$0xff] }
  0x16   : > { %v265_v13 = vadd.f32 %v264_v10, %v995_v6  ;;  %258 = vadd.xlane.f32.xlu1 %v257_v8  ;;  %v1022_v18 = vld [vmem:[%s978_s18 + $0x10] sm:$0xff]  ;;  %v261_v22 = vadd.f32 %v260_v17, %v1017_v16  ;;  %v1041_v27 = vld [vmem:[%s978_s18 + $0x88] sm:$0xff]  ;;  %v276_v29 = vsel %vm247_vm0, %v1035_v25, 0.0  ;;  %v1049_v30 = vld [vmem:[%s978_s18 + $0x60] sm:$0xff]  ;;  %v272_v31 = vsel %vm247_vm0, %v1038_v26, 0.0 }
  0x17   : > { %250 = vadd.xlane.f32.xlu0 %v249_v12  ;;  %v1027_v20 = vld [vmem:[%s978_s18 + $0x50] sm:$0xff]  ;;  %v253_v23 = vadd.f32 %v252_v19, %v1022_v18  ;;  %v1054_v32 = vld [vmem:[%s978_s18 + $0x80] sm:$0xff]  ;;  %v280_v33 = vsel %vm247_vm0, %v1041_v27, 0.0  ;;  %v273_v35 = vadd.f32 %v272_v31, %v1049_v30  ;;  %v1062_v37 = vld [vmem:[%s978_s18 + $0xa8] sm:$0xff] }
  0x18   : > { %266 = vadd.xlane.f32.xlu2 %v265_v13  ;;  %v269_v24 = vadd.f32 %v268_v21, %v1027_v20  ;;  %v1044_v28 = vld [vmem:[%s978_s18 + $0x70] sm:$0xff]  ;;  %v281_v36 = vadd.f32 %v280_v33, %v1054_v32  ;;  %v1065_v38 = vld [vmem:[%s978_s18 + $0x98] sm:$0xff]  ;;  %v1071_v40 = vld [vmem:[%s978_s18 + $0xa0] sm:$0xff]  ;;  %v288_v41 = vsel %vm247_vm0, %v1062_v37, 0.0 }
  0x19   : > { %v277_v34 = vadd.f32 %v276_v29, %v1044_v28  ;;  %v1068_v39 = vld [vmem:[%s978_s18 + $0xb8] sm:$0xff]  ;;  %v1076_v42 = vld [vmem:[%s978_s18 + $0x90] sm:$0xff]  ;;  %v284_v43 = vsel %vm247_vm0, %v1065_v38, 0.0  ;;  %v289_v46 = vadd.f32 %v288_v41, %v1071_v40  ;;  %v657_v49 = vld [vmem:[%s1094_s22 + $0x8] sm:$0xff] }
  0x1a   : > { %v1081_v44 = vld [vmem:[%s978_s18 + $0xb0] sm:$0xff]  ;;  %v292_v45 = vsel %vm247_vm0, %v1068_v39, 0.0  ;;  %v285_v47 = vadd.f32 %v284_v43, %v1076_v42  ;;  %v656_v50 = vld [vmem:[%s1094_s22] sm:$0xff]  ;;  %v659_v53 = vld [vmem:[%s1094_s22 + $0x18] sm:$0xff] }
  0x1b   : > { %v293_v48 = vadd.f32 %v292_v45, %v1081_v44  ;;  %v658_v51 = vld [vmem:[%s1094_s22 + $0x10] sm:$0xff]  ;;  %v660_v52 = vld [vmem:[%s1094_s22 + $0x20] sm:$0xff]  ;;  %v661_v54 = vld [vmem:[%s1094_s22 + $0x28] sm:$0xff] }
  0x1c   : > { %v663_v55 = vld [vmem:[%s1094_s22 + $0x38] sm:$0xff]  ;;  %v662_v56 = vld [vmem:[%s1094_s22 + $0x30] sm:$0xff]  ;;  %v664_v57 = vld [vmem:[%s1094_s22 + $0x40] sm:$0xff] }
  0x1e   : > { %262 = vadd.xlane.f32.xlu1 %v261_v22 }
  0x1f   : > { %254 = vadd.xlane.f32.xlu0 %v253_v23 }
  0x20   : > { %270 = vadd.xlane.f32.xlu2 %v269_v24 }
  0x26   : > { %278 = vadd.xlane.f32.xlu1 %v277_v34 }
  0x27   : > { %274 = vadd.xlane.f32.xlu0 %v273_v35 }
  0x28   : > { %282 = vadd.xlane.f32.xlu2 %v281_v36 }
  0x2e   : > { %290 = vadd.xlane.f32.xlu1 %v289_v46 }
  0x2f   : > { %286 = vadd.xlane.f32.xlu0 %v285_v47 }
  0x30   : > { %294 = vadd.xlane.f32.xlu2 %v293_v48 }
  0x43   : > { %675 = vperm.xlu0 %907, %v657_v49  }
  0x47   : > { %670 = vperm.xlu1 %906, %v656_v50  }
  0x48   : > { %680 = vperm.xlu2 %908, %v658_v51  }
  0x4b   : > { %690 = vperm.xlu0 %907, %v660_v52  }
  0x4f   : > { %685 = vperm.xlu1 %906, %v659_v53  }
  0x50   : > { %695 = vperm.xlu2 %908, %v661_v54  }
  0x53   : > { %705 = vperm.xlu0 %907, %v663_v55  }
  0x57   : > { %700 = vperm.xlu1 %906, %v662_v56  }
  0x58   : > { %710 = vperm.xlu2 %908, %v664_v57  }
  0x89   : > { %v259_v58 = vpop.xlane.xlu1 %258 }
  0x8a   : > { %v298_v59 = vmul.f32 0.0069444445, %v259_v58  ;;  %v251_v60 = vpop.xlane.xlu0 %250 }
  0x8b   : > { %v267_v61 = vpop.xlane.xlu2 %266  ;;  %v296_v62 = vmul.f32 0.0069444445, %v251_v60 }
  0x8c   : > { %v1106_v63 = vsub.f32 %v981_v1, %v298_v59  ;;  %v1109_v0 = vsub.f32 %v984_v2, %v298_v59  ;;  %v300_v2 = vmul.f32 0.0069444445, %v267_v61 }
  0x8d   : > { %v1112_v4 = vsub.f32 %v987_v3, %v296_v62  ;;  %v1115_v8 = vsub.f32 %v992_v5, %v296_v62 }
  0x8e   : > { %v336_v9 = vmul.f32 %v1106_v63, %v1106_v63  ;;  %v337_v10 = vmul.f32 %v1109_v0, %v1109_v0  ;;  %v1128_v31 = vsub.f32 %v998_v7, %v300_v2 }
  0x8f   : > { %v332_v12 = vmul.f32 %v1112_v4, %v1112_v4  ;;  %v333_v1 = vmul.f32 %v1115_v8, %v1115_v8 }
  0x90   : > { %v364_v13 = vsel %vm247_vm0, %v337_v10, 0.0  ;;  %v341_v46 = vmul.f32 %v1128_v31, %v1128_v31 }
  0x91   : > { %v263_v3 = vpop.xlane.xlu1 %262  ;;  %v365_v17 = vadd.f32 %v364_v13, %v336_v9  ;;  %v356_v5 = vsel %vm247_vm0, %v333_v1, 0.0 }
  0x92   : > { %v299_v19 = vmul.f32 0.0069444445, %v263_v3  ;;  %v255_v21 = vpop.xlane.xlu0 %254  ;;  %v357_v22 = vadd.f32 %v356_v5, %v332_v12  ;;  %v372_v59 = vsel %vm247_vm0, %v341_v46, 0.0 }
  0x93   : > { %v271_v23 = vpop.xlane.xlu2 %270  ;;  %v297_v24 = vmul.f32 0.0069444445, %v255_v21  ;;  %366 = vadd.xlane.f32.xlu2 %v365_v17 }
  0x94   : > { %v301_v29 = vmul.f32 0.0069444445, %v271_v23  ;;  %v1131_v33 = vsub.f32 %v1017_v16, %v299_v19  ;;  %v1134_v34 = vsub.f32 %v1006_v11, %v299_v19  ;;  %358 = vadd.xlane.f32.xlu0 %v357_v22 }
  0x95   : > { %v1137_v35 = vsub.f32 %v1022_v18, %v297_v24  ;;  %v1140_v36 = vsub.f32 %v1011_v14, %v297_v24 }
  0x96   : > { %v1143_v41 = vsub.f32 %v1027_v20, %v301_v29  ;;  %v1146_v43 = vsub.f32 %v1014_v15, %v301_v29  ;;  %v338_v7 = vmul.f32 %v1131_v33, %v1131_v33  ;;  %v339_v11 = vmul.f32 %v1134_v34, %v1134_v34 }
  0x97   : > { %v334_v16 = vmul.f32 %v1137_v35, %v1137_v35  ;;  %v335_v18 = vmul.f32 %v1140_v36, %v1140_v36  ;;  %v1161_v15 = vsub.f32 %v995_v6, %v300_v2 }
  0x98   : > { %v342_v14 = vmul.f32 %v1143_v41, %v1143_v41  ;;  %v343_v20 = vmul.f32 %v1146_v43, %v1146_v43  ;;  %v368_v45 = vsel %vm247_vm0, %v339_v11, 0.0 }
  0x99   : > { %v369_v47 = vadd.f32 %v368_v45, %v338_v7  ;;  %v360_v48 = vsel %vm247_vm0, %v335_v18, 0.0  ;;  %v279_v49 = vpop.xlane.xlu1 %278  ;;  %v340_v58 = vmul.f32 %v1161_v15, %v1161_v15 }
  0x9a   : > { %v376_v50 = vsel %vm247_vm0, %v343_v20, 0.0  ;;  %v275_v51 = vpop.xlane.xlu0 %274  ;;  %v361_v52 = vadd.f32 %v360_v48, %v334_v16  ;;  %v303_v53 = vmul.f32 0.0069444445, %v279_v49 }
  0x9b   : > { %v283_v54 = vpop.xlane.xlu2 %282  ;;  %v377_v55 = vadd.f32 %v376_v50, %v342_v14  ;;  %v302_v56 = vmul.f32 0.0069444445, %v275_v51 }
  0x9c   : > { %v304_v57 = vmul.f32 0.0069444445, %v283_v54  ;;  %370 = vadd.xlane.f32.xlu0 %v369_v47  ;;  %362 = vadd.xlane.f32.xlu1 %v361_v52  ;;  %v1169_v6 = vsub.f32 %v1035_v25, %v303_v53  ;;  %v1195_v12 = vsub.f32 %v1044_v28, %v303_v53 }
  0x9d   : > { %v1175_v60 = vsub.f32 %v1049_v30, %v302_v56  ;;  %v1178_v61 = vsub.f32 %v1038_v26, %v302_v56  ;;  %378 = vadd.xlane.f32.xlu2 %v377_v55 }
  0x9e   : > { %v1181_v62 = vsub.f32 %v1054_v32, %v304_v57  ;;  %v1184_v9 = vsub.f32 %v1041_v27, %v304_v57  ;;  %v373_v32 = vadd.f32 %v372_v59, %v340_v58  ;;  %v347_v27 = vmul.f32 %v1169_v6, %v1169_v6 }
  0x9f   : > { %v344_v25 = vmul.f32 %v1175_v60, %v1175_v60  ;;  %v345_v10 = vmul.f32 %v1178_v61, %v1178_v61  ;;  %v346_v24 = vmul.f32 %v1195_v12, %v1195_v12 }
  0xa0   : > { %v348_v30 = vmul.f32 %v1181_v62, %v1181_v62  ;;  %v349_v26 = vmul.f32 %v1184_v9, %v1184_v9  ;;  %v384_v29 = vsel %vm247_vm0, %v347_v27, 0.0 }
  0xa1   : > { %v380_v1 = vsel %vm247_vm0, %v345_v10, 0.0  ;;  %v291_v2 = vpop.xlane.xlu1 %290 }
  0xa2   : > { %v388_v13 = vsel %vm247_vm0, %v349_v26, 0.0  ;;  %v287_v3 = vpop.xlane.xlu0 %286  ;;  %v381_v17 = vadd.f32 %v380_v1, %v344_v25  ;;  %v306_v5 = vmul.f32 0.0069444445, %v291_v2 }
  0xa3   : > { %v295_v19 = vpop.xlane.xlu2 %294  ;;  %v389_v21 = vadd.f32 %v388_v13, %v348_v30  ;;  %v305_v22 = vmul.f32 0.0069444445, %v287_v3 }
  0xa4   : > { %v307_v23 = vmul.f32 0.0069444445, %v295_v19  ;;  %374 = vadd.xlane.f32.xlu1 %v373_v32  ;;  %382 = vadd.xlane.f32.xlu0 %v381_v17  ;;  %v1202_v28 = vsub.f32 %v1062_v37, %v306_v5  ;;  %v1228_v20 = vsub.f32 %v1071_v40, %v306_v5 }
  0xa5   : > { %v1208_v7 = vsub.f32 %v1076_v42, %v305_v22  ;;  %v1211_v11 = vsub.f32 %v1065_v38, %v305_v22  ;;  %390 = vadd.xlane.f32.xlu2 %v389_v21 }
  0xa6   : > { %1537 = vst [vmem:[#allocation2_spill] sm:$0xff] %v1202_v28  ;;  %v1214_v16 = vsub.f32 %v1081_v44, %v307_v23  ;;  %v1217_v18 = vsub.f32 %v1068_v39, %v307_v23  ;;  %v385_v44 = vadd.f32 %v384_v29, %v346_v24  ;;  %v353_v46 = vmul.f32 %v1202_v28, %v1202_v28 }
  0xa7   : > { %1538 = vst [vmem:[#allocation3_spill] sm:$0xff] %v1208_v7  ;;  %v350_v37 = vmul.f32 %v1208_v7, %v1208_v7  ;;  %v351_v14 = vmul.f32 %v1211_v11, %v1211_v11  ;;  %v352_v49 = vmul.f32 %v1228_v20, %v1228_v20 }
  0xa8   : > { %1539 = vst [vmem:[#allocation4_spill] sm:$0xff] %v1211_v11  ;;  %v354_v42 = vmul.f32 %v1214_v16, %v1214_v16  ;;  %v355_v38 = vmul.f32 %v1217_v18, %v1217_v18  ;;  %v396_v50 = vsel %vm247_vm0, %v353_v46, 0.0 }
  0xa9   : > { %1540 = vst [vmem:[#allocation5_spill] sm:$0xff] %v1228_v20  ;;  %v392_v39 = vsel %vm247_vm0, %v351_v14, 0.0  ;;  %v397_v40 = vadd.f32 %v396_v50, %v352_v49 }
  0xaa   : > { %v400_v45 = vsel %vm247_vm0, %v355_v38, 0.0  ;;  %v393_v47 = vadd.f32 %v392_v39, %v350_v37 }
  0xab   : > { %v401_v48 = vadd.f32 %v400_v45, %v354_v42  ;;  %v1237_v51 = vpop.permute.xlu2 %680 }
  0xac   : > { %386 = vadd.xlane.f32.xlu1 %v385_v44  ;;  %394 = vadd.xlane.f32.xlu0 %v393_v47 }
  0xad   : > { %402 = vadd.xlane.f32.xlu2 %v401_v48 }
  0xb3   : > { %v1243_v54 = vpop.permute.xlu2 %695 }
  0xb4   : > { %398 = vadd.xlane.f32.xlu1 %v397_v40 }
  0xb5   : > { %v1239_v52 = vpop.permute.xlu0 %675 }
  0xb9   : > { %v1241_v53 = vpop.permute.xlu1 %670 }
  0xbb   : > { %v1249_v57 = vpop.permute.xlu2 %710 }
  0xbd   : > { %v1245_v55 = vpop.permute.xlu0 %690 }
  0xc1   : > { %v1247_v56 = vpop.permute.xlu1 %685 }
  0xc5   : > { %v1251_v58 = vpop.permute.xlu0 %705 }
  0xc9   : > { %v1253_v25 = vpop.permute.xlu1 %700 }
 0x106   : > { %v367_v59 = vpop.xlane.xlu2 %366 }
 0x107   : > { %v406_v10 = vmul.f32 0.0069444445, %v367_v59  ;;  %v359_v30 = vpop.xlane.xlu0 %358 }
 0x108   : > { %v404_v26 = vmul.f32 0.0069444445, %v359_v30 }
 0x109   : > { %v430_v32 = vadd.f32 0.001, %v406_v10 }
 0x10a   : > { %v428_v27 = vadd.f32 0.001, %v404_v26 }
 0x10b   : > { %909 = vrsqrt.f32 %v430_v32  ;;  %vm466_vm1 = vweird.f32 %v430_v32 }
 0x10c   : > { %911 = vrsqrt.f32 %v428_v27  ;;  %vm446_vm5 = vweird.f32 %v428_v27 }
 0x10f   : > { %v363_v1 = vpop.xlane.xlu1 %362  ;;  %v371_v2 = vpop.xlane.xlu0 %370 }
 0x110   : > { %v405_v13 = vmul.f32 0.0069444445, %v363_v1  ;;  %v407_v3 = vmul.f32 0.0069444445, %v371_v2  ;;  %v379_v17 = vpop.xlane.xlu2 %378 }
 0x111   : > { %v910_v5 = vpop.eup %909  ;;  %v409_v19 = vmul.f32 0.0069444445, %v379_v17 }
 0x112   : > { %v912_v21 = vpop.eup %911  ;;  %v461_v22 = vmul.f32 %v910_v5, %v430_v32  ;;  %v1255_v23 = vadd.f32 0.001, %v405_v13  ;;  %v1257_v24 = vadd.f32 0.001, %v407_v3  ;;  %vm467_vm2 = vweird.f32 %v910_v5  ;;  %v416_v32 = vld [vmem:[%s1271_s25] sm:$0xff] }
 0x113   : > { %v441_v29 = vmul.f32 %v912_v21, %v428_v27  ;;  %v1259_v37 = vadd.f32 0.001, %v409_v19  ;;  %vm447_vm3 = vweird.f32 %v912_v21  ;;  %vm1289_vm4 = vmor %vm466_vm1, %vm467_vm2 }
 0x114   : > { %v462_v14 = vmul.f32 %v910_v5, %v461_v22  ;;  %913 = vrsqrt.f32 %v1255_v23  ;;  %vm448_vm6 = vmor %vm446_vm5, %vm447_vm3  ;;  %vm476_vm8 = vweird.f32 %v1257_v24  ;;  %vm456_vm10 = vweird.f32 %v1255_v23 }
 0x115   : > { %v442_v42 = vmul.f32 %v912_v21, %v441_v29  ;;  %915 = vrsqrt.f32 %v1257_v24  ;;  %vm496_vm13 = vweird.f32 %v1259_v37 }
 0x116   : > { %v463_v38 = vmul.f32 0.5, %v462_v14  ;;  %917 = vrsqrt.f32 %v1259_v37 }
 0x117   : > { %v443_v44 = vmul.f32 0.5, %v442_v42  ;;  %v375_v39 = vpop.xlane.xlu1 %374  ;;  %v383_v45 = vpop.xlane.xlu0 %382  ;;  %v418_v42 = vld [vmem:[%s1271_s25 + $0x10] sm:$0xff] }
 0x118   : > { %v464_v46 = vsub.f32 1.5, %v463_v38  ;;  %v408_v47 = vmul.f32 0.0069444445, %v375_v39  ;;  %v410_v48 = vmul.f32 0.0069444445, %v383_v45  ;;  %v391_v49 = vpop.xlane.xlu2 %390 }
 0x119   : > { %v444_v50 = vsub.f32 1.5, %v443_v44  ;;  %v412_v40 = vmul.f32 0.0069444445, %v391_v49 }
 0x11a   : > { %v1264_v59 = vpop.eup %913  ;;  %v1273_v10 = vadd.f32 0.001, %v408_v47  ;;  %v1275_v30 = vadd.f32 0.001, %v410_v48  ;;  %v465_v13 = vmul.f32 %v910_v5, %v464_v46 }
 0x11b   : > { %v1277_v26 = vpop.eup %915  ;;  %v451_v1 = vmul.f32 %v1264_v59, %v1255_v23  ;;  %v1281_v2 = vadd.f32 0.001, %v412_v40  ;;  %v445_v3 = vmul.f32 %v912_v21, %v444_v50  ;;  %vm457_vm7 = vweird.f32 %v1264_v59 }
 0x11c   : > { %v1283_v17 = vpop.eup %917  ;;  %v471_v19 = vmul.f32 %v1277_v26, %v1257_v24  ;;  %919 = vrsqrt.f32 %v1273_v10  ;;  %v469_v46 = vsel %vm1289_vm4, %v910_v5, %v465_v13  ;;  %vm477_vm9 = vweird.f32 %v1277_v26  ;;  %vm1332_vm11 = vmor %vm456_vm10, %vm457_vm7 }
 0x11d   : > { %v452_v29 = vmul.f32 %v1264_v59, %v451_v1  ;;  %v491_v14 = vmul.f32 %v1283_v17, %v1259_v37  ;;  %921 = vrsqrt.f32 %v1275_v30  ;;  %v449_v47 = vsel %vm448_vm6, %v912_v21, %v445_v3  ;;  %vm478_vm12 = vmor %vm476_vm8, %vm477_vm9 }
 0x11e   : > { %v472_v38 = vmul.f32 %v1277_v26, %v471_v19  ;;  %923 = vrsqrt.f32 %v1281_v2  ;;  %v562_v40 = vmul.f32 %v469_v46, %v418_v42  ;;  %v560_v11 = vmul.f32 %v449_v47, %v416_v32  ;;  %v417_v46 = vld [vmem:[%s1271_s25 + $0x8] sm:$0xff] }
 0x11f   : > { %v453_v44 = vmul.f32 0.5, %v452_v29  ;;  %v492_v39 = vmul.f32 %v1283_v17, %v491_v14  ;;  %v387_v45 = vpop.xlane.xlu1 %386  ;;  %v395_v27 = vpop.xlane.xlu0 %394  ;;  %vm497_vm14 = vweird.f32 %v1283_v17  ;;  %vm486_vm2 = vweird.f32 %v1273_v10 }
 0x120   : > { %v473_v48 = vmul.f32 0.5, %v472_v38  ;;  %v411_v49 = vmul.f32 0.0069444445, %v387_v45  ;;  %v413_v50 = vmul.f32 0.0069444445, %v395_v27  ;;  %v403_v1 = vpop.xlane.xlu2 %402  ;;  %584 = vperm.xlu2 %908, %v562_v40   ;;  %574 = vperm.xlu0 %907, %v560_v11   ;;  %vm1357_vm1 = vmor %vm496_vm13, %vm497_vm14  ;;  %vm526_vm4 = vweird.f32 %v1281_v2 }
 0x121   : > { %v415_v7 = vmul.f32 0.0069444445, %v403_v1  ;;  %v493_v28 = vmul.f32 0.5, %v492_v39  ;;  %v454_v22 = vsub.f32 1.5, %v453_v44  ;;  %vm506_vm7 = vweird.f32 %v1275_v30 }
 0x122   : > { %v1305_v19 = vpop.eup %919  ;;  %v1307_v20 = vadd.f32 0.001, %v411_v49  ;;  %v1309_v29 = vadd.f32 0.001, %v413_v50  ;;  %v474_v5 = vsub.f32 1.5, %v473_v48  ;;  %v419_v48 = vld [vmem:[%s1271_s25 + $0x18] sm:$0xff] }
 0x123   : > { %v1311_v14 = vpop.eup %921  ;;  %v481_v21 = vmul.f32 %v1305_v19, %v1273_v10  ;;  %v1315_v13 = vadd.f32 0.001, %v415_v7  ;;  %v494_v11 = vsub.f32 1.5, %v493_v28  ;;  %v455_v47 = vmul.f32 %v1264_v59, %v454_v22 }
 0x124   : > { %v1317_v3 = vpop.eup %923  ;;  %v501_v42 = vmul.f32 %v1311_v14, %v1275_v30  ;;  %925 = vrsqrt.f32 %v1307_v20  ;;  %v475_v49 = vmul.f32 %v1277_v26, %v474_v5  ;;  %vm487_vm15 = vweird.f32 %v1305_v19 }
 0x125   : > { %v482_v38 = vmul.f32 %v1305_v19, %v481_v21  ;;  %v521_v7 = vmul.f32 %v1317_v3, %v1281_v2  ;;  %927 = vrsqrt.f32 %v1309_v29  ;;  %v459_v40 = vsel %vm1332_vm11, %v1264_v59, %v455_v47  ;;  %vm1368_vm3 = vmor %vm486_vm2, %vm487_vm15  ;;  %v421_v47 = vld [vmem:[%s1271_s25 + $0x28] sm:$0xff] }
 0x126   : > { %v502_v32 = vmul.f32 %v1311_v14, %v501_v42  ;;  %929 = vrsqrt.f32 %v1315_v13  ;;  %v479_v1 = vsel %vm478_vm12, %v1277_v26, %v475_v49  ;;  %v561_v24 = vmul.f32 %v459_v40, %v417_v46 }
 0x127   : > { %v483_v39 = vmul.f32 0.5, %v482_v38  ;;  %v522_v45 = vmul.f32 %v1317_v3, %v521_v7  ;;  %v399_v27 = vpop.xlane.xlu1 %398  ;;  %v563_v21 = vmul.f32 %v479_v1, %v419_v48  ;;  %v495_v37 = vmul.f32 %v1283_v17, %v494_v11 }
 0x128   : > { %v414_v28 = vmul.f32 0.0069444445, %v399_v27  ;;  %v503_v59 = vmul.f32 0.5, %v502_v32  ;;  %579 = vperm.xlu1 %906, %v561_v24   ;;  %v420_v27 = vld [vmem:[%s1271_s25 + $0x20] sm:$0xff]  ;;  %vm527_vm5 = vweird.f32 %v1317_v3  ;;  %vm507_vm8 = vweird.f32 %v1311_v14 }
 0x129   : > { %v484_v23 = vsub.f32 1.5, %v483_v39  ;;  %v523_v50 = vmul.f32 0.5, %v522_v45  ;;  %589 = vperm.xlu2 %908, %v563_v21   ;;  %v499_v48 = vsel %vm1357_vm1, %v1283_v17, %v495_v37  ;;  %vm1396_vm9 = vmor %vm526_vm4, %vm527_vm5  ;;  %vm516_vm10 = vweird.f32 %v1307_v20 }
 0x12a   : > { %v926_v22 = vpop.eup %925  ;;  %v1352_v5 = vadd.f32 0.001, %v414_v28  ;;  %v504_v49 = vsub.f32 1.5, %v503_v59  ;;  %v565_v1 = vmul.f32 %v499_v48, %v421_v47  ;;  %v423_v59 = vld [vmem:[%s1271_s25 + $0x38] sm:$0xff]  ;;  %vm1412_vm12 = vmor %vm506_vm7, %vm507_vm8  ;;  %vm556_vm13 = vweird.f32 %v1315_v13  ;;  %v422_v47 = vld [vmem:[%s1271_s25 + $0x30] sm:$0xff] }
 0x12b   : > { %v1355_v42 = vpop.eup %927  ;;  %v511_v26 = vmul.f32 %v926_v22, %v1307_v20  ;;  %v485_v7 = vmul.f32 %v1305_v19, %v484_v23  ;;  %v524_v10 = vsub.f32 1.5, %v523_v50  ;;  %vm517_vm6 = vweird.f32 %v926_v22 }
 0x12c   : > { %v1364_v44 = vpop.eup %929  ;;  %v531_v39 = vmul.f32 %v1355_v42, %v1309_v29  ;;  %931 = vrsqrt.f32 %v1352_v5  ;;  %v505_v11 = vmul.f32 %v1311_v14, %v504_v49  ;;  %vm518_vm11 = vmor %vm516_vm10, %vm517_vm6  ;;  %vm536_vm1 = vweird.f32 %v1309_v29 }
 0x12d   : > { %v512_v32 = vmul.f32 %v926_v22, %v511_v26  ;;  %v551_v45 = vmul.f32 %v1364_v44, %v1315_v13  ;;  %v489_v46 = vsel %vm1368_vm3, %v1305_v19, %v485_v7  ;;  %v525_v21 = vmul.f32 %v1317_v3, %v524_v10 }
 0x12e   : > { %v532_v23 = vmul.f32 %v1355_v42, %v531_v39  ;;  %v564_v40 = vmul.f32 %v489_v46, %v420_v27  ;;  %vm557_vm14 = vweird.f32 %v1364_v44  ;;  %vm537_vm3 = vweird.f32 %v1355_v42 }
 0x12f   : > { %v513_v28 = vmul.f32 0.5, %v512_v32  ;;  %v552_v50 = vmul.f32 %v1364_v44, %v551_v45  ;;  %v424_v32 = vld [vmem:[%s1271_s25 + $0x40] sm:$0xff]  ;;  %v529_v45 = vsel %vm1396_vm9, %v1317_v3, %v525_v21  ;;  %v509_v3 = vsel %vm1412_vm12, %v1311_v14, %v505_v11  ;;  %vm1424_vm2 = vmor %vm556_vm13, %vm557_vm14  ;;  %v426_v14 = vld [vmem:[%s1271_s25 + $0x50] sm:$0xff] }
 0x130   : > { %v533_v37 = vmul.f32 0.5, %v532_v23  ;;  %594 = vperm.xlu1 %906, %v564_v40   ;;  %v568_v48 = vmul.f32 %v529_v45, %v424_v32  ;;  %vm546_vm4 = vweird.f32 %v1352_v5  ;;  %v427_v40 = vld [vmem:[%s1271_s25 + $0x58] sm:$0xff]  ;;  %vm538_vm6 = vmor %vm536_vm1, %vm537_vm3 }
 0x131   : > { %v514_v24 = vsub.f32 1.5, %v513_v28  ;;  %v553_v19 = vmul.f32 0.5, %v552_v50  ;;  %599 = vperm.xlu2 %908, %v565_v1   ;;  %v566_v28 = vmul.f32 %v509_v3, %v422_v47 }
 0x132   : > { %v932_v26 = vpop.eup %931  ;;  %v534_v46 = vsub.f32 1.5, %v533_v37  ;;  %v666_v37 = vld [vmem:[%s1094_s22 + $0x50] sm:$0xff] }
 0x133   : > { %v541_v38 = vmul.f32 %v932_v26, %v1352_v5  ;;  %v515_v7 = vmul.f32 %v926_v22, %v514_v24  ;;  %v554_v39 = vsub.f32 1.5, %v553_v19  ;;  %vm547_vm15 = vweird.f32 %v932_v26  ;;  %v425_v19 = vld [vmem:[%s1271_s25 + $0x48] sm:$0xff] }
 0x134   : > { %v535_v50 = vmul.f32 %v1355_v42, %v534_v46  ;;  %vm548_vm5 = vmor %vm546_vm4, %vm547_vm15 }
 0x135   : > { %v542_v10 = vmul.f32 %v932_v26, %v541_v38  ;;  %v519_v2 = vsel %vm518_vm11, %v926_v22, %v515_v7  ;;  %v555_v49 = vmul.f32 %v1364_v44, %v554_v39  ;;  %v667_v38 = vld [vmem:[%s1094_s22 + $0x58] sm:$0xff] }
 0x136   : > { %v567_v27 = vmul.f32 %v519_v2, %v423_v59  ;;  %v539_v5 = vsel %vm538_vm6, %v1355_v42, %v535_v50 }
 0x137   : > { %v543_v22 = vmul.f32 0.5, %v542_v10  ;;  %v559_v1 = vsel %vm1424_vm2, %v1364_v44, %v555_v49  ;;  %v569_v17 = vmul.f32 %v539_v5, %v425_v19 }
 0x138   : > { %609 = vperm.xlu0 %907, %v567_v27   ;;  %604 = vperm.xlu1 %906, %v566_v28   ;;  %v571_v21 = vmul.f32 %v559_v1, %v427_v40 }
 0x139   : > { %v544_v30 = vsub.f32 1.5, %v543_v22  ;;  %614 = vperm.xlu2 %908, %v568_v48  }
 0x13b   : > { %v545_v23 = vmul.f32 %v932_v26, %v544_v30 }
 0x13d   : > { %v549_v29 = vsel %vm548_vm5, %v932_v26, %v545_v23  ;;  %v665_v26 = vld [vmem:[%s1094_s22 + $0x48] sm:$0xff] }
 0x13e   : > { %v570_v24 = vmul.f32 %v549_v29, %v426_v14 }
 0x140   : > { %624 = vperm.xlu0 %907, %v570_v24   ;;  %619 = vperm.xlu1 %906, %v569_v17  }
 0x141   : > { %629 = vperm.xlu2 %908, %v571_v21  }
 0x148   : > { %720 = vperm.xlu0 %907, %v666_v37   ;;  %715 = vperm.xlu1 %906, %v665_v26  }
 0x149   : > { %725 = vperm.xlu2 %908, %v667_v38  }
 0x17a   : > { %v585_v59 = vpop.permute.xlu2 %584 }
 0x17b   : > { %v636_v44 = vmul.f32 %v585_v59, %v1106_v63  ;;  %v637_v7 = vmul.f32 %v585_v59, %v1109_v0 }
 0x17d   : > { %v732_v11 = vadd.f32 %v1237_v51, %v636_v44  ;;  %v733_v42 = vadd.f32 %v1237_v51, %v637_v7 }
 0x17f   : > { %v756_v39 = vmax.f32 %v732_v11, 0.0  ;;  %v757_v10 = vmax.f32 %v733_v42, 0.0 }
 0x181   : > { %780 = vst [vmem:[%s1450_s28 + $0x20] sm:$0xff] %v756_v39 }
 0x182   : > { %781 = vst.msk [vmem:[%s1450_s28 + $0x28] sm:$0xff] %vm247_vm0, %v757_v10 }
 0x183   : > { %v590_v63 = vpop.permute.xlu2 %589 }
 0x184   : > { %v638_v0 = vmul.f32 %v590_v63, %v1131_v33  ;;  %v639_v51 = vmul.f32 %v590_v63, %v1134_v34 }
 0x186   : > { %v734_v2 = vadd.f32 %v1247_v56, %v638_v0  ;;  %v735_v32 = vadd.f32 %v1247_v56, %v639_v51 }
 0x188   : > { %v758_v45 = vmax.f32 %v734_v2, 0.0  ;;  %v759_v20 = vmax.f32 %v735_v32, 0.0 }
 0x18a   : > { %782 = vst [vmem:[%s1450_s28 + $0x30] sm:$0xff] %v758_v45  ;;  %v1556_v45 = vld [vmem:[#allocation2_spill] sm:$0xff] }
 0x18b   : > { %783 = vst.msk [vmem:[%s1450_s28 + $0x38] sm:$0xff] %vm247_vm0, %v759_v20  ;;  %v600_v27 = vpop.permute.xlu2 %599 }
 0x18c   : > { %v642_v46 = vmul.f32 %v600_v27, %v1143_v41  ;;  %v643_v22 = vmul.f32 %v600_v27, %v1146_v43 }
 0x18e   : > { %v738_v47 = vadd.f32 %v1243_v54, %v642_v46  ;;  %v739_v33 = vadd.f32 %v1243_v54, %v643_v22  ;;  %v1557_v22 = vld [vmem:[#allocation3_spill] sm:$0xff] }
 0x190   : > { %v762_v34 = vmax.f32 %v738_v47, 0.0  ;;  %v763_v3 = vmax.f32 %v739_v33, 0.0  ;;  %v1558_v33 = vld [vmem:[#allocation4_spill] sm:$0xff] }
 0x192   : > { %786 = vst [vmem:[%s1450_s28 + $0x50] sm:$0xff] %v762_v34  ;;  %v575_v48 = vpop.permute.xlu0 %574 }
 0x193   : > { %787 = vst.msk [vmem:[%s1450_s28 + $0x58] sm:$0xff] %vm247_vm0, %v763_v3  ;;  %v615_v56 = vpop.permute.xlu2 %614  ;;  %v632_v30 = vmul.f32 %v575_v48, %v1112_v4  ;;  %v633_v41 = vmul.f32 %v575_v48, %v1115_v8 }
 0x194   : > { %v648_v43 = vmul.f32 %v615_v56, %v1181_v62  ;;  %v649_v49 = vmul.f32 %v615_v56, %v1184_v9 }
 0x195   : > { %v728_v54 = vadd.f32 %v1241_v53, %v632_v30  ;;  %v729_v13 = vadd.f32 %v1241_v53, %v633_v41 }
 0x196   : > { %v744_v28 = vadd.f32 %v1249_v57, %v648_v43  ;;  %v745_v14 = vadd.f32 %v1249_v57, %v649_v49 }
 0x197   : > { %v752_v23 = vmax.f32 %v728_v54, 0.0  ;;  %v753_v4 = vmax.f32 %v729_v13, 0.0 }
 0x198   : > { %v768_v50 = vmax.f32 %v744_v28, 0.0  ;;  %v769_v29 = vmax.f32 %v745_v14, 0.0 }
 0x199   : > { %776 = vst [vmem:[%s1450_s28] sm:$0xff] %v752_v23 }
 0x19a   : > { %792 = vst [vmem:[%s1450_s28 + $0x80] sm:$0xff] %v768_v50  ;;  %v580_v8 = vpop.permute.xlu1 %579 }
 0x19b   : > { %793 = vst.msk [vmem:[%s1450_s28 + $0x88] sm:$0xff] %vm247_vm0, %v769_v29  ;;  %v630_v62 = vpop.permute.xlu2 %629  ;;  %v634_v9 = vmul.f32 %v580_v8, %v1137_v35  ;;  %v635_v53 = vmul.f32 %v580_v8, %v1140_v36 }
 0x19c   : > { %777 = vst.msk [vmem:[%s1450_s28 + $0x8] sm:$0xff] %vm247_vm0, %v753_v4  ;;  %v654_v19 = vmul.f32 %v630_v62, %v1214_v16  ;;  %v655_v5 = vmul.f32 %v630_v62, %v1217_v18 }
 0x19d   : > { %v730_v57 = vadd.f32 %v1239_v52, %v634_v9  ;;  %v731_v40 = vadd.f32 %v1239_v52, %v635_v53 }
 0x19f   : > { %v754_v1 = vmax.f32 %v730_v57, 0.0  ;;  %v755_v24 = vmax.f32 %v731_v40, 0.0 }
 0x1a1   : > { %778 = vst [vmem:[%s1450_s28 + $0x10] sm:$0xff] %v754_v1 }
 0x1a2   : > { %779 = vst.msk [vmem:[%s1450_s28 + $0x18] sm:$0xff] %vm247_vm0, %v755_v24  ;;  %v595_v21 = vpop.permute.xlu1 %594 }
 0x1a3   : > { %v726_v17 = vpop.permute.xlu2 %725  ;;  %v640_v35 = vmul.f32 %v595_v21, %v1161_v15  ;;  %v641_v36 = vmul.f32 %v595_v21, %v1128_v31 }
 0x1a4   : > { %v750_v37 = vadd.f32 %v726_v17, %v654_v19  ;;  %v751_v52 = vadd.f32 %v726_v17, %v655_v5 }
 0x1a5   : > { %v736_v38 = vadd.f32 %v1245_v55, %v640_v35  ;;  %v737_v16 = vadd.f32 %v1245_v55, %v641_v36 }
 0x1a6   : > { %v774_v26 = vmax.f32 %v750_v37, 0.0  ;;  %v775_v59 = vmax.f32 %v751_v52, 0.0 }
 0x1a7   : > { %v760_v44 = vmax.f32 %v736_v38, 0.0  ;;  %v761_v7 = vmax.f32 %v737_v16, 0.0 }
 0x1a8   : > { %798 = vst [vmem:[%s1450_s28 + $0xb0] sm:$0xff] %v774_v26 }
 0x1a9   : > { %799 = vst.msk [vmem:[%s1450_s28 + $0xb8] sm:$0xff] %vm247_vm0, %v775_v59 }
 0x1aa   : > { %v610_v18 = vpop.permute.xlu0 %609  ;;  %784 = vst [vmem:[%s1450_s28 + $0x40] sm:$0xff] %v760_v44  ;;  %v605_v42 = vpop.permute.xlu1 %604 }
 0x1ab   : > { %v646_v11 = vmul.f32 %v610_v18, %v1195_v12  ;;  %v647_v15 = vmul.f32 %v610_v18, %v1169_v6  ;;  %785 = vst.msk [vmem:[%s1450_s28 + $0x48] sm:$0xff] %vm247_vm0, %v761_v7  ;;  %v644_v39 = vmul.f32 %v605_v42, %v1175_v60  ;;  %v645_v10 = vmul.f32 %v605_v42, %v1178_v61 }
 0x1ad   : > { %v742_v31 = vadd.f32 %v1251_v58, %v646_v11  ;;  %v743_v55 = vadd.f32 %v1251_v58, %v647_v15  ;;  %v740_v6 = vadd.f32 %v1253_v25, %v644_v39  ;;  %v741_v0 = vadd.f32 %v1253_v25, %v645_v10  ;;  %v1555_v58 = vld [vmem:[#allocation5_spill] sm:$0xff] }
 0x1af   : > { %v766_v63 = vmax.f32 %v742_v31, 0.0  ;;  %v767_v12 = vmax.f32 %v743_v55, 0.0  ;;  %v764_v2 = vmax.f32 %v740_v6, 0.0  ;;  %v765_v32 = vmax.f32 %v741_v0, 0.0 }
 0x1b1   : > { %790 = vst [vmem:[%s1450_s28 + $0x70] sm:$0xff] %v766_v63 }
 0x1b2   : > { %791 = vst.msk [vmem:[%s1450_s28 + $0x78] sm:$0xff] %vm247_vm0, %v767_v12  ;;  %v625_v51 = vpop.permute.xlu0 %624  ;;  %v620_v60 = vpop.permute.xlu1 %619 }
 0x1b3   : > { %788 = vst [vmem:[%s1450_s28 + $0x60] sm:$0xff] %v764_v2  ;;  %v652_v61 = vmul.f32 %v625_v51, %v1555_v58  ;;  %v653_v20 = vmul.f32 %v625_v51, %v1556_v45  ;;  %v650_v47 = vmul.f32 %v620_v60, %v1557_v22  ;;  %v651_v34 = vmul.f32 %v620_v60, %v1558_v33 }
 0x1b4   : > { %789 = vst.msk [vmem:[%s1450_s28 + $0x68] sm:$0xff] %vm247_vm0, %v765_v32 }
 0x1ba   : > { %v721_v27 = vpop.permute.xlu0 %720  ;;  %v716_v56 = vpop.permute.xlu1 %715 }
 0x1bb   : > { %v748_v25 = vadd.f32 %v721_v27, %v652_v61  ;;  %v749_v46 = vadd.f32 %v721_v27, %v653_v20  ;;  %v746_v30 = vadd.f32 %v716_v56, %v650_v47  ;;  %v747_v41 = vadd.f32 %v716_v56, %v651_v34 }
 0x1bd   : > { %v772_v3 = vmax.f32 %v748_v25, 0.0  ;;  %v773_v48 = vmax.f32 %v749_v46, 0.0  ;;  %v770_v43 = vmax.f32 %v746_v30, 0.0  ;;  %v771_v49 = vmax.f32 %v747_v41, 0.0 }
 0x1bf   : > { %796 = vst [vmem:[%s1450_s28 + $0xa0] sm:$0xff] %v772_v3 }
 0x1c0   : > { %797 = vst.msk [vmem:[%s1450_s28 + $0xa8] sm:$0xff] %vm247_vm0, %v773_v48 }
 0x1c1   : > { %794 = vst [vmem:[%s1450_s28 + $0x90] sm:$0xff] %v770_v43 }
 0x1c2   : > { %795 = vst.msk [vmem:[%s1450_s28 + $0x98] sm:$0xff] %vm247_vm0, %v771_v49 }
 0x1c3 PF: > { %s13_s12 = sadd.s32 1, %s939_s12  }
 0x1c4   : > { %p10_p4 = scmp.ge.s32.totalorder %s13_s12, 4  }
 0x1c6   :  { %12 = sbr.rel (!%p10_p4) target bundleno = 1 (0x1), region = 68 }

</bundles_post_ra>
